<compile_context>
chip_gen: v7x
topology: tpu7x:2x2x1
jax: 0.10.0
libtpu: 0.0.40
codegen_flags: <defaults>
</compile_context>

<pallas_src>
import jax
import jax.numpy as jnp
from jax.experimental import pallas as pl
from jax.experimental.pallas import tpu as pltpu

_LANE_W = 1024         # lane-dense last dim (multiple of 128)
_MAX_TILE_ROWS = 512   # 512 * 1024 * 4 B = 2 MiB f32 tile per grid step


def _round_up(x: int, m: int) -> int:
    return ((x + m - 1) // m) * m


def _fwi_forward_kernel(bounds_ref, param_ref, out_ref):
    """out = sigmoid(param) * (max_vel - min_vel) + min_vel (elementwise)."""
    min_v = bounds_ref[0]          # SMEM f32 scalar
    max_v = bounds_ref[1]          # SMEM f32 scalar
    p = param_ref[...]
    # sigmoid via EUP exp + EUP approximate reciprocal (vrcp).
    sig = pl.reciprocal(1.0 + jnp.exp(-p), approx=True)
    out_ref[...] = sig * (max_v - min_v) + min_v


def fwi_forward(param, min_vel, max_vel):
    """Constrained-model forward pass as a Pallas TPU kernel.

    Accepts a parameter array of any shape; internally flattened and blocked
    into lane-dense (tile_rows, 1024) slabs.
    """
    orig_shape = param.shape
    dtype = param.dtype
    flat = param.reshape(-1)
    n = flat.size

    # Row count of the lane-dense slab, padded to the (8, 128) layout grain.
    rows = _round_up(pl.cdiv(n, _LANE_W), 8)
    # Grid sizing: ~2 MiB tiles; tiny models become a single block. Larger
    # models naturally get >=2 grid steps, which lets v7x shard the
    # ("parallel",) row loop across its 2 TensorCores.
    num_tiles = pl.cdiv(rows, _MAX_TILE_ROWS)
    tile_rows = _round_up(pl.cdiv(rows, num_tiles), 8)
    padded_rows = tile_rows * num_tiles
    padded_n = padded_rows * _LANE_W
    if padded_n != n:
        flat = jnp.pad(flat, (0, padded_n - n))
    slab = flat.reshape(padded_rows, _LANE_W)

    bounds = jnp.asarray([min_vel, max_vel], dtype=jnp.float32)

    out = pl.pallas_call(
        _fwi_forward_kernel,
        out_shape=jax.ShapeDtypeStruct((padded_rows, _LANE_W), dtype),
        grid=(num_tiles,),
        in_specs=[
            pl.BlockSpec(memory_space=pltpu.MemorySpace.SMEM),     # bounds
            pl.BlockSpec((tile_rows, _LANE_W), lambda i: (i, 0)),  # params
        ],
        out_specs=pl.BlockSpec((tile_rows, _LANE_W), lambda i: (i, 0)),
        compiler_params=pltpu.CompilerParams(
            dimension_semantics=("parallel",),
            # Explicit scoped-VMEM budget: 2 MiB in + 2 MiB out, double
            # buffered, fits with large headroom on v5e/v6e/v7x.
            vmem_limit_bytes=32 * 1024 * 1024,
        ),
    )(bounds, slab)

    return out.reshape(-1)[:n].reshape(orig_shape)


class FWIModel:
    """JAX/Pallas equivalent of the PyTorch Model."""

    def __init__(self, initial, min_vel, max_vel):
        self.min_vel = float(min_vel)
        self.max_vel = float(max_vel)
        # torch.logit((initial - min) / (max - min)), mirrored in JAX (glue).
        # Note: like torch.logit (no eps), this yields +/-inf if `initial`
        # touches a bound exactly; forward() then returns that bound.
        frac = (initial - self.min_vel) / (self.max_vel - self.min_vel)
        self.model = jnp.log(frac) - jnp.log1p(-frac)  # logit

    def forward(self):
        return fwi_forward(self.model, self.min_vel, self.max_vel)


if __name__ == "__main__":
    key = jax.random.PRNGKey(0)

    # Small velocity model; deliberately NOT lane-aligned to exercise the
    # flatten / pad / lane-dense re-blocking path.
    ny, nx = 48, 100
    min_vel, max_vel = 1500.0, 4500.0

    # Deterministic "initial" velocity strictly inside (min_vel, max_vel).
    u = jax.random.uniform(key, (ny, nx), dtype=jnp.float32,
                           minval=0.05, maxval=0.95)
    initial = min_vel + u * (max_vel - min_vel)

    m = FWIModel(initial, min_vel, max_vel)
    out = jax.block_until_ready(m.forward())

    # Sanity check against plain-JAX reference (should recover `initial`).
    ref = jax.nn.sigmoid(m.model) * (max_vel - min_vel) + min_vel
    assert out.shape == (ny, nx) and out.dtype == jnp.float32
    assert jnp.allclose(out, ref, rtol=2e-3, atol=2.0)
    assert jnp.allclose(out, initial, rtol=2e-3, atol=2.0)

    print("KERNEL_OK")
</pallas_src>

<mosaic_0001>
module attributes {stable_mosaic.version = 11 : i64} {
  func.func @_fwi_forward_kernel(%arg0: i32, %arg1: memref<2xf32, #tpu.memory_space<smem>>, %arg2: memref<8x1024xf32, #tpu.memory_space<vmem>>, %arg3: memref<8x1024xf32, #tpu.memory_space<vmem>>) attributes {dimension_semantics = [#tpu.dimension_semantics<parallel>], iteration_bounds = array<i64: 1>, scalar_prefetch = 0 : i64, scratch_operands = 0 : i64, tpu.core_type = #tpu.core_type<tc>, window_params = [{transform_indices = @transform_0, window_bounds = array<i64: 2>}, {transform_indices = @transform_1, window_bounds = array<i64: 8, 1024>}, {transform_indices = @transform_2, window_bounds = array<i64: 8, 1024>}]} {
    %c0 = arith.constant 0 : index
    %0 = memref.load %arg1[%c0] : memref<2xf32, #tpu.memory_space<smem>>
    %c1 = arith.constant 1 : index
    %1 = memref.load %arg1[%c1] : memref<2xf32, #tpu.memory_space<smem>>
    %c0_0 = arith.constant 0 : index
    %c0_1 = arith.constant 0 : index
    %2 = vector.load %arg2[%c0_0, %c0_1] : memref<8x1024xf32, #tpu.memory_space<vmem>>, vector<8x1024xf32>
    %cst = arith.constant 0.000000e+00 : f32
    %3 = vector.broadcast %cst : f32 to vector<8x1024xf32>
    %4 = arith.subf %3, %2 : vector<8x1024xf32>
    %5 = math.exp %4 : vector<8x1024xf32>
    %cst_2 = arith.constant 1.000000e+00 : f32
    %6 = vector.broadcast %cst_2 : f32 to vector<8x1024xf32>
    %7 = arith.addf %6, %5 : vector<8x1024xf32>
    %8 = tpu.reciprocal %7 {approx = true} : vector<8x1024xf32> -> vector<8x1024xf32>
    %9 = arith.subf %1, %0 : f32
    %10 = vector.broadcast %9 : f32 to vector<8x1024xf32>
    %11 = arith.mulf %8, %10 : vector<8x1024xf32>
    %12 = vector.broadcast %0 : f32 to vector<8x1024xf32>
    %13 = arith.addf %11, %12 : vector<8x1024xf32>
    %c0_3 = arith.constant 0 : index
    %c0_4 = arith.constant 0 : index
    %14 = vector.load %arg3[%c0_3, %c0_4] : memref<8x1024xf32, #tpu.memory_space<vmem>>, vector<8x1024xf32>
    tpu.vector_store %arg3[%c0_3, %c0_4], %13 {strides = array<i32>} : memref<8x1024xf32, #tpu.memory_space<vmem>>, vector<8x1024xf32>,
    return
  }
  func.func @transform_0(%arg0: i32) -> i32 {
    %c0_i32 = arith.constant 0 : i32
    %c0_i32_0 = arith.constant 0 : i32
    return %c0_i32 : i32
  }
  func.func @transform_1(%arg0: i32) -> (i32, i32) {
    %c0_i32 = arith.constant 0 : i32
    %c0_i32_0 = arith.constant 0 : i32
    return %arg0, %c0_i32 : i32, i32
  }
  func.func @transform_2(%arg0: i32) -> (i32, i32) {
    %c0_i32 = arith.constant 0 : i32
    %c0_i32_0 = arith.constant 0 : i32
    return %arg0, %c0_i32 : i32, i32
  }
}

</mosaic_0001>

<bundles_post_ra>
// kernel: tpu_custom_call.1
= control target key start
LH: loop header
LB: loop body
LE: loop exit
PB: predicated region body
PF: predicated region fallthrough
CT: control target
= control target key end

     0   :  { %7 = vsyncpa [#allocation5], 0  ;;  %s278_s0 = inlined_call_operand.hbm [shape: f32[2], index: 0, kind: input, shape index: {}]   ;;  %s279_s1 = inlined_call_operand.hbm [shape: f32[8,1024], index: 1, kind: input, shape index: {}]   ;;  %s280_s2 = inlined_call_operand.hbm [shape: f32[8,1024], index: 2, kind: output, shape index: {}]  }
   0x1   :  { %8 = vsyncpa [#allocation3], 0 }
   0x2   :  { %9 = vsyncpa [#allocation4], 0  ;;  %s164_s11 = scalar_lea.hbm %s278_s0, 16 }
   0x3   :  { %p165_p0 = scmp.ne.s32.totalorder %s278_s0, %s164_s11  ;;  %p168_p1 = scmp.lt.u32.totalorder %s164_s11, %s278_s0 }
   0x5   :  { %p170_p2 = pnand %p168_p1, %p165_p0 }
   0x7   :  { %173 = shalt.err (!%p170_p2)
}
   0x8   :  { %s224_s16 = smov [#allocation2]   ;;  %s225_s19 = smov [#allocation6]  }
   0x9   :  { %17 = dma.hbm_to_smem %s278_s0, 16, %s224_s16, [#allocation5]  }
   0xa   :  { %s24_s20 = sshll.u32 %s225_s19, 4  ;;  %s174_s23 = scalar_lea.hbm %s279_s1, 1024  ;;  %s25_s20 = int_to_ptr.vmem [resolvable:$true] %s24_s20 }
   0xb   :  { %p175_p3 = scmp.ne.s32.totalorder %s279_s1, %s174_s23  ;;  %p178_p4 = scmp.lt.u32.totalorder %s174_s23, %s279_s1 }
   0xd   :  { %p180_p5 = pnand %p178_p4, %p175_p3 }
   0xf   :  { %183 = shalt.err (!%p180_p5)
}
  0x10   :  { %s184_s28 = scalar_lea.vmem %s25_s20, 1024  ;;  %p189_p7 = scmp.lt.s32.totalorder %s25_s20, %s25_s20 }
  0x11   :  { %p185_p6 = scmp.ne.s32.totalorder %s25_s20, %s184_s28  ;;  %p190_p8 = scmp.lt.s32.totalorder %s184_s28, %s184_s28 }
  0x13   :  { %p191_p9 = por %p190_p8, %p189_p7 }
  0x15   :  { %p192_p10 = pnand %p191_p9, %p185_p6 }
  0x17   :  { %195 = shalt.err (!%p192_p10)
}
  0x18   :  { %27 = dma.hbm_to_vmem [thread:$0]  %s279_s1, 1024, %s25_s20, [#allocation3]  }
  0x19   :  { %218 = dma.done.wait [#allocation5], 16  }
  0x1a   :  { %219 = vsyncadd [#allocation5], 4294967280 }
  0x1b   :  { %220 = dma.done.wait [#allocation3], 1024  }
  0x1c   :  { %221 = vsyncadd [#allocation3], 4294966272 }
  0x1d   :  { %34 = sfence }
  0x1e   :  { %v37_v0 = vld [vmem:[#allocation6] sm:$0xff]  ;;  %v38_v1 = vld [vmem:[#allocation6 + $0x8] sm:$0xff]  ;;  %v39_v4 = vld [vmem:[#allocation6 + $0x10] sm:$0xff]  ;;  %s35_s1 = sld [smem:[#allocation2]]  ;;  %s128_s30 = sld [smem:[#allocation2 + $0x1]] }
  0x1f   :  { %v45_v2 = vsub.f32 0.0, %v37_v0  ;;  %v46_v3 = vsub.f32 0.0, %v38_v1  ;;  %v40_v5 = vld [vmem:[#allocation6 + $0x18] sm:$0xff]  ;;  %v41_v6 = vld [vmem:[#allocation6 + $0x20] sm:$0xff]  ;;  %v47_v7 = vsub.f32 0.0, %v39_v4  ;;  %v42_v10 = vld [vmem:[#allocation6 + $0x28] sm:$0xff] }
  0x20   :  { %v48_v8 = vsub.f32 0.0, %v40_v5  ;;  %v49_v9 = vsub.f32 0.0, %v41_v6  ;;  %v43_v11 = vld [vmem:[#allocation6 + $0x30] sm:$0xff]  ;;  %v44_v12 = vld [vmem:[#allocation6 + $0x38] sm:$0xff]  ;;  %v50_v15 = vsub.f32 0.0, %v42_v10  ;;  %s226_s4 = smov [#allocation7]  }
  0x21   :  { %v53_v13 = vmul.f32 1.442695, %v45_v2  ;;  %v55_v14 = vmul.f32 1.442695, %v46_v3  ;;  %v51_v16 = vsub.f32 0.0, %v43_v11  ;;  %v52_v20 = vsub.f32 0.0, %v44_v12 }
  0x22   :  { %v57_v17 = vmul.f32 1.442695, %v47_v7  ;;  %v59_v18 = vmul.f32 1.442695, %v48_v8  ;;  %v61_v19 = vmul.f32 1.442695, %v49_v9 }
  0x23   :  { %132 = vpow2.f32 %v53_v13  ;;  %v63_v21 = vmul.f32 1.442695, %v50_v15  ;;  %v65_v22 = vmul.f32 1.442695, %v51_v16  ;;  %v67_v23 = vmul.f32 1.442695, %v52_v20 }
  0x24   :  { %134 = vpow2.f32 %v55_v14  ;;  %s85_s3 = ssub.f32 %s128_s30, %s35_s1  ;;  %v95_v42 = vstv %s35_s1  ;;  %s118_s5 = sshll.u32 %s226_s4, 4  ;;  %s119_s5 = int_to_ptr.vmem [resolvable:$true] %s118_s5 }
  0x25   :  { %136 = vpow2.f32 %v57_v17  ;;  %s196_s6 = scalar_lea.vmem %s119_s5, 1024  ;;  %p201_p12 = scmp.lt.s32.totalorder %s119_s5, %s119_s5 }
  0x26   :  { %138 = vpow2.f32 %v59_v18  ;;  %v86_v40 = vstv %s85_s3  ;;  %p197_p11 = scmp.ne.s32.totalorder %s119_s5, %s196_s6  ;;  %p202_p13 = scmp.lt.s32.totalorder %s196_s6, %s196_s6 }
  0x27   :  { %140 = vpow2.f32 %v61_v19 }
  0x28   :  { %142 = vpow2.f32 %v63_v21  ;;  %p203_p0 = por %p202_p13, %p201_p12 }
  0x29   :  { %144 = vpow2.f32 %v65_v22 }
  0x2a   :  { %146 = vpow2.f32 %v67_v23  ;;  %p204_p1 = pnand %p203_p0, %p197_p11 }
  0x2d   :  { %v133_v24 = vpop.eup %132 }
  0x2e   :  { %v135_v25 = vpop.eup %134  ;;  %v69_v26 = vadd.f32 1.0, %v133_v24 }
  0x2f   :  { %v137_v27 = vpop.eup %136  ;;  %v70_v28 = vadd.f32 1.0, %v135_v25 }
  0x30   :  { %v139_v29 = vpop.eup %138  ;;  %148 = vrcp.f32 %v69_v26  ;;  %v71_v30 = vadd.f32 1.0, %v137_v27 }
  0x31   :  { %v141_v31 = vpop.eup %140  ;;  %150 = vrcp.f32 %v70_v28  ;;  %v72_v32 = vadd.f32 1.0, %v139_v29 }
  0x32   :  { %v143_v33 = vpop.eup %142  ;;  %152 = vrcp.f32 %v71_v30  ;;  %v73_v34 = vadd.f32 1.0, %v141_v31 }
  0x33   :  { %v145_v35 = vpop.eup %144  ;;  %154 = vrcp.f32 %v72_v32  ;;  %v74_v36 = vadd.f32 1.0, %v143_v33 }
  0x34   :  { %v147_v37 = vpop.eup %146  ;;  %156 = vrcp.f32 %v73_v34  ;;  %v75_v38 = vadd.f32 1.0, %v145_v35 }
  0x35   :  { %158 = vrcp.f32 %v74_v36  ;;  %v76_v39 = vadd.f32 1.0, %v147_v37 }
  0x36   :  { %160 = vrcp.f32 %v75_v38 }
  0x37   :  { %162 = vrcp.f32 %v76_v39 }
  0x3a   :  { %v149_v41 = vpop.eup %148 }
  0x3b   :  { %v151_v43 = vpop.eup %150  ;;  %v87_v44 = vmul.f32 %v149_v41, %v86_v40 }
  0x3c   :  { %v153_v45 = vpop.eup %152  ;;  %v88_v46 = vmul.f32 %v151_v43, %v86_v40 }
  0x3d   :  { %v155_v47 = vpop.eup %154  ;;  %v96_v48 = vadd.f32 %v95_v42, %v87_v44  ;;  %v89_v49 = vmul.f32 %v153_v45, %v86_v40 }
  0x3e   :  { %v157_v50 = vpop.eup %156  ;;  %v97_v51 = vadd.f32 %v95_v42, %v88_v46  ;;  %v90_v52 = vmul.f32 %v155_v47, %v86_v40 }
  0x3f   :  { %v159_v53 = vpop.eup %158  ;;  %104 = vst [vmem:[#allocation7] sm:$0xff] %v96_v48  ;;  %v98_v54 = vadd.f32 %v95_v42, %v89_v49  ;;  %v91_v55 = vmul.f32 %v157_v50, %v86_v40 }
  0x40   :  { %v161_v56 = vpop.eup %160  ;;  %105 = vst [vmem:[#allocation7 + $0x8] sm:$0xff] %v97_v51  ;;  %v99_v57 = vadd.f32 %v95_v42, %v90_v52  ;;  %v92_v58 = vmul.f32 %v159_v53, %v86_v40 }
  0x41   :  { %v163_v59 = vpop.eup %162  ;;  %106 = vst [vmem:[#allocation7 + $0x10] sm:$0xff] %v98_v54  ;;  %v100_v60 = vadd.f32 %v95_v42, %v91_v55  ;;  %v93_v61 = vmul.f32 %v161_v56, %v86_v40 }
  0x42   :  { %107 = vst [vmem:[#allocation7 + $0x18] sm:$0xff] %v99_v57  ;;  %v101_v62 = vadd.f32 %v95_v42, %v92_v58  ;;  %v94_v63 = vmul.f32 %v163_v59, %v86_v40 }
  0x43   :  { %108 = vst [vmem:[#allocation7 + $0x20] sm:$0xff] %v100_v60  ;;  %v102_v0 = vadd.f32 %v95_v42, %v93_v61 }
  0x44   :  { %109 = vst [vmem:[#allocation7 + $0x28] sm:$0xff] %v101_v62  ;;  %v103_v1 = vadd.f32 %v95_v42, %v94_v63 }
  0x45   :  { %110 = vst [vmem:[#allocation7 + $0x30] sm:$0xff] %v102_v0 }
  0x46   :  { %111 = vst [vmem:[#allocation7 + $0x38] sm:$0xff] %v103_v1 }
  0x47   :  { %207 = shalt.err (!%p204_p1)
}
  0x48   :  { %s208_s9 = scalar_lea.hbm %s280_s2, 1024 }
  0x49   :  { %p209_p2 = scmp.ne.s32.totalorder %s280_s2, %s208_s9  ;;  %p212_p3 = scmp.lt.u32.totalorder %s208_s9, %s280_s2 }
  0x4b   :  { %p214_p4 = pnand %p212_p3, %p209_p2 }
  0x4d   :  { %217 = shalt.err (!%p214_p4)
}
  0x4e   :  { %121 = dma.vmem_to_hbm [thread:$0]  %s119_s5, 1024, %s280_s2, [#allocation4]  }
  0x4f   :  { %222 = dma.done.wait [#allocation4], 1024  }
  0x50   :  { %223 = vsyncadd [#allocation4], 4294966272 }
  0x51   :  { %125 = vsyncpa [#allocation3], 1 }
  0x52   :  { %126 = vsyncpa [#allocation4], 1 }
  0x53   :  { %127 = vsyncpa [#allocation5], 1 }

</bundles_post_ra>
